<compile_context>
chip_gen: v5e
topology: v5e:2x2
jax: 0.10.0
libtpu: 0.0.40
codegen_flags: <defaults>
</compile_context>

<pallas_src>
import math
import jax
import jax.numpy as jnp
from jax.experimental import pallas as pl
from jax.experimental.pallas import tpu as pltpu


def position_classifier_kernel(x_ref, wih_t_ref, whh_t_ref, bias_ref,
                               fcw_ref, fcb_ref, out_ref, gx_ref):
    # x_ref:   (T*2B, D)  time-major rows: row = t*2B + b
    # gx_ref:  (T, 2B, 4H) VMEM scratch for the hoisted input projection
    T, B2, H4 = gx_ref.shape
    H = whh_t_ref.shape[0]
    B = out_ref.shape[0]

    # --- Hoisted input projection: one MXU call for all (clip, timestep) rows.
    gx = (jnp.dot(x_ref[...], wih_t_ref[...],
                  preferred_element_type=jnp.float32)
          + bias_ref[...])                              # (T*2B, 4H)
    gx_ref[...] = gx.reshape(T, B2, H4)

    whh_t = whh_t_ref[...]                              # (H, 4H)

    h0 = jnp.zeros((B2, H), jnp.float32)
    c0 = jnp.zeros((B2, H), jnp.float32)

    def step(t, carry):
        h, c = carry
        # Only the recurrent matmul stays on the serial critical path.
        gates = gx_ref[t] + jnp.dot(h, whh_t,
                                    preferred_element_type=jnp.float32)  # (2B, 4H)
        sig = jax.nn.sigmoid(gates)                     # full 128-lane EUP push
        th = jnp.tanh(gates)                            # full 128-lane EUP push
        i = sig[:, 0 * H:1 * H]
        f = sig[:, 1 * H:2 * H]
        g = th[:, 2 * H:3 * H]
        o = sig[:, 3 * H:4 * H]
        c_new = f * c + i * g
        h_new = o * jnp.tanh(c_new)
        return (h_new, c_new)

    h_fin, _ = jax.lax.fori_loop(0, T, step, (h0, c0), unroll=True)

    # MLP interaction: concat(h1, h2) -> Linear(2H, 1) as VPU mul + lane reduce
    # (avoids an N=1 MXU matmul in the epilogue).
    combined = jnp.concatenate([h_fin[:B], h_fin[B:]], axis=1)   # (B, 2H)
    out = (jnp.sum(combined * fcw_ref[...], axis=-1, keepdims=True)
           + fcb_ref[...])                                       # (B, 1)
    out_ref[...] = out.astype(out_ref.dtype)


def position_classifier_forward(clip1, clip2, params):
    B, T, D = clip1.shape
    H = params["whh_t"].shape[0]
    # Batch both clips into a single recurrence (halves the serial chain) and
    # lay rows out time-major so the hoisted input projection is one
    # contiguous (T*2B, D) x (D, 4H) matmul.
    x = jnp.concatenate([clip1, clip2], axis=0)          # (2B, T, D)
    x = jnp.swapaxes(x, 0, 1).reshape(T * 2 * B, D)      # (T*2B, D)
    return pl.pallas_call(
        position_classifier_kernel,
        out_shape=jax.ShapeDtypeStruct((B, 1), jnp.float32),
        in_specs=[pl.BlockSpec(memory_space=pltpu.MemorySpace.VMEM)] * 6,
        out_specs=pl.BlockSpec(memory_space=pltpu.MemorySpace.VMEM),
        scratch_shapes=[pltpu.VMEM((T, 2 * B, 4 * H), jnp.float32)],
    )(x, params["wih_t"], params["whh_t"], params["bias"],
      params["fcw"], params["fcb"])


def init_params(key, input_size, hidden_size):
    """Deterministic init mirroring PyTorch LSTM / Linear uniform(-1/sqrt(H), 1/sqrt(H))."""
    k = 1.0 / math.sqrt(hidden_size)
    keys = jax.random.split(key, 6)
    w_ih = jax.random.uniform(keys[0], (4 * hidden_size, input_size), jnp.float32, -k, k)
    w_hh = jax.random.uniform(keys[1], (4 * hidden_size, hidden_size), jnp.float32, -k, k)
    b_ih = jax.random.uniform(keys[2], (4 * hidden_size,), jnp.float32, -k, k)
    b_hh = jax.random.uniform(keys[3], (4 * hidden_size,), jnp.float32, -k, k)
    kf = 1.0 / math.sqrt(2 * hidden_size)
    fc_w = jax.random.uniform(keys[4], (1, 2 * hidden_size), jnp.float32, -kf, kf)
    fc_b = jax.random.uniform(keys[5], (1,), jnp.float32, -kf, kf)
    return {
        "wih_t": w_ih.T,                                  # (D, 4H)
        "whh_t": w_hh.T,                                  # (H, 4H)
        "bias": (b_ih + b_hh).reshape(1, -1),             # (1, 4H)
        "fcw": fc_w,                                      # (1, 2H)
        "fcb": fc_b.reshape(1, 1),                        # (1, 1)
    }


def reference_forward(clip1, clip2, params):
    """Pure-JAX reference (same semantics as the PyTorch module, default config)."""
    H = params["whh_t"].shape[0]

    def run_lstm(x):
        B = x.shape[0]
        h0 = jnp.zeros((B, H), jnp.float32)
        c0 = jnp.zeros((B, H), jnp.float32)

        def step(carry, xt):
            h, c = carry
            gates = xt @ params["wih_t"] + h @ params["whh_t"] + params["bias"]
            i = jax.nn.sigmoid(gates[:, 0 * H:1 * H])
            f = jax.nn.sigmoid(gates[:, 1 * H:2 * H])
            g = jnp.tanh(gates[:, 2 * H:3 * H])
            o = jax.nn.sigmoid(gates[:, 3 * H:4 * H])
            c_new = f * c + i * g
            h_new = o * jnp.tanh(c_new)
            return (h_new, c_new), None

        (h_fin, _), _ = jax.lax.scan(step, (h0, c0), jnp.swapaxes(x, 0, 1))
        return h_fin

    h1 = run_lstm(clip1)
    h2 = run_lstm(clip2)
    combined = jnp.concatenate([h1, h2], axis=1)
    return combined @ params["fcw"].T + params["fcb"]


if __name__ == "__main__":
    B, T, D, H = 2, 8, 16, 32   # batch, seq_len, input_size, hidden_size

    key = jax.random.PRNGKey(0)
    k_c1, k_c2, k_p = jax.random.split(key, 3)
    clip1 = jax.random.normal(k_c1, (B, T, D), jnp.float32)
    clip2 = jax.random.normal(k_c2, (B, T, D), jnp.float32)
    params = init_params(k_p, D, H)

    out = position_classifier_forward(clip1, clip2, params)
    out = jax.block_until_ready(out)

    ref = reference_forward(clip1, clip2, params)
    assert out.shape == (B, 1)
    assert jnp.allclose(out, ref, rtol=1e-5, atol=1e-5), (out, ref)

    print("KERNEL_OK")
</pallas_src>

<mosaic_0001>
module attributes {stable_mosaic.version = 11 : i64} {
  func.func @position_classifier_kernel(%arg0: memref<32x16xf32, #tpu.memory_space<vmem>>, %arg1: memref<16x128xf32, #tpu.memory_space<vmem>>, %arg2: memref<32x128xf32, #tpu.memory_space<vmem>>, %arg3: memref<1x128xf32, #tpu.memory_space<vmem>>, %arg4: memref<1x64xf32, #tpu.memory_space<vmem>>, %arg5: memref<1x1xf32, #tpu.memory_space<vmem>>, %arg6: memref<2x1xf32, #tpu.memory_space<vmem>>, %arg7: memref<8x4x128xf32, #tpu.memory_space<vmem>>) attributes {dimension_semantics = [], scalar_prefetch = 0 : i64, scratch_operands = 1 : i64, tpu.core_type = #tpu.core_type<tc>} {
    %c0 = arith.constant 0 : index
    %c0_0 = arith.constant 0 : index
    %0 = vector.load %arg0[%c0, %c0_0] : memref<32x16xf32, #tpu.memory_space<vmem>>, vector<32x16xf32>
    %c0_1 = arith.constant 0 : index
    %c0_2 = arith.constant 0 : index
    %1 = vector.load %arg1[%c0_1, %c0_2] : memref<16x128xf32, #tpu.memory_space<vmem>>, vector<16x128xf32>
    %cst = arith.constant dense<0.000000e+00> : vector<32x128xf32>
    %2 = tpu.matmul %0, %1, %cst {dimension_numbers = #tpu.dot_dimension_numbers<[1], [0], [0], [1], [0, 0, 1, 1], [], []>} : vector<32x16xf32>, vector<16x128xf32>, vector<32x128xf32> -> vector<32x128xf32>
    %c0_3 = arith.constant 0 : index
    %c0_4 = arith.constant 0 : index
    %3 = vector.load %arg3[%c0_3, %c0_4] : memref<1x128xf32, #tpu.memory_space<vmem>>, vector<1x128xf32>
    %4 = vector.broadcast %3 : vector<1x128xf32> to vector<32x128xf32>
    %5 = arith.addf %2, %4 : vector<32x128xf32>
    %6 = vector.shape_cast %5 : vector<32x128xf32> to vector<8x4x128xf32>
    %c0_5 = arith.constant 0 : index
    %c0_6 = arith.constant 0 : index
    %c0_7 = arith.constant 0 : index
    %7 = vector.load %arg7[%c0_5, %c0_6, %c0_7] : memref<8x4x128xf32, #tpu.memory_space<vmem>>, vector<8x4x128xf32>
    tpu.vector_store %arg7[%c0_5, %c0_6, %c0_7], %6 {strides = array<i32>} : memref<8x4x128xf32, #tpu.memory_space<vmem>>, vector<8x4x128xf32>,
    %c0_8 = arith.constant 0 : index
    %c0_9 = arith.constant 0 : index
    %8 = vector.load %arg2[%c0_8, %c0_9] : memref<32x128xf32, #tpu.memory_space<vmem>>, vector<32x128xf32>
    %cst_10 = arith.constant 0.000000e+00 : f32
    %9 = vector.broadcast %cst_10 : f32 to vector<4x32xf32>
    %cst_11 = arith.constant 0.000000e+00 : f32
    %10 = vector.broadcast %cst_11 : f32 to vector<4x32xf32>
    %c0_i32 = arith.constant 0 : i32
    %11 = arith.index_cast %c0_i32 : i32 to index
    %c0_12 = arith.constant 0 : index
    %c0_13 = arith.constant 0 : index
    %12 = vector.load %arg7[%11, %c0_12, %c0_13] : memref<8x4x128xf32, #tpu.memory_space<vmem>>, vector<1x4x128xf32>
    %13 = vector.shape_cast %12 : vector<1x4x128xf32> to vector<4x128xf32>
    %cst_14 = arith.constant dense<0.000000e+00> : vector<4x128xf32>
    %14 = tpu.matmul %9, %8, %cst_14 {dimension_numbers = #tpu.dot_dimension_numbers<[1], [0], [0], [1], [0, 0, 1, 1], [], []>} : vector<4x32xf32>, vector<32x128xf32>, vector<4x128xf32> -> vector<4x128xf32>
    %15 = arith.addf %13, %14 : vector<4x128xf32>
    %16 = arith.negf %15 : vector<4x128xf32>
    %17 = math.exp %16 : vector<4x128xf32>
    %cst_15 = arith.constant 1.000000e+00 : f32
    %18 = vector.broadcast %cst_15 : f32 to vector<4x128xf32>
    %19 = arith.addf %18, %17 : vector<4x128xf32>
    %20 = arith.divf %18, %19 : vector<4x128xf32>
    %21 = math.tanh %15 : vector<4x128xf32>
    %22 = vector.extract_strided_slice %20 {offsets = [0, 0], sizes = [4, 32], strides = [1, 1]} : vector<4x128xf32> to vector<4x32xf32>
    %23 = vector.extract_strided_slice %20 {offsets = [0, 32], sizes = [4, 32], strides = [1, 1]} : vector<4x128xf32> to vector<4x32xf32>
    %24 = vector.extract_strided_slice %21 {offsets = [0, 64], sizes = [4, 32], strides = [1, 1]} : vector<4x128xf32> to vector<4x32xf32>
    %25 = vector.extract_strided_slice %20 {offsets = [0, 96], sizes = [4, 32], strides = [1, 1]} : vector<4x128xf32> to vector<4x32xf32>
    %26 = arith.mulf %23, %10 : vector<4x32xf32>
    %27 = arith.mulf %22, %24 : vector<4x32xf32>
    %28 = arith.addf %26, %27 : vector<4x32xf32>
    %29 = math.tanh %28 : vector<4x32xf32>
    %30 = arith.mulf %25, %29 : vector<4x32xf32>
    %c1_i32 = arith.constant 1 : i32
    %31 = arith.index_cast %c1_i32 : i32 to index
    %c0_16 = arith.constant 0 : index
    %c0_17 = arith.constant 0 : index
    %32 = vector.load %arg7[%31, %c0_16, %c0_17] : memref<8x4x128xf32, #tpu.memory_space<vmem>>, vector<1x4x128xf32>
    %33 = vector.shape_cast %32 : vector<1x4x128xf32> to vector<4x128xf32>
    %cst_18 = arith.constant dense<0.000000e+00> : vector<4x128xf32>
    %34 = tpu.matmul %30, %8, %cst_18 {dimension_numbers = #tpu.dot_dimension_numbers<[1], [0], [0], [1], [0, 0, 1, 1], [], []>} : vector<4x32xf32>, vector<32x128xf32>, vector<4x128xf32> -> vector<4x128xf32>
    %35 = arith.addf %33, %34 : vector<4x128xf32>
    %36 = arith.negf %35 : vector<4x128xf32>
    %37 = math.exp %36 : vector<4x128xf32>
    %cst_19 = arith.constant 1.000000e+00 : f32
    %38 = vector.broadcast %cst_19 : f32 to vector<4x128xf32>
    %39 = arith.addf %38, %37 : vector<4x128xf32>
    %40 = arith.divf %38, %39 : vector<4x128xf32>
    %41 = math.tanh %35 : vector<4x128xf32>
    %42 = vector.extract_strided_slice %40 {offsets = [0, 0], sizes = [4, 32], strides = [1, 1]} : vector<4x128xf32> to vector<4x32xf32>
    %43 = vector.extract_strided_slice %40 {offsets = [0, 32], sizes = [4, 32], strides = [1, 1]} : vector<4x128xf32> to vector<4x32xf32>
    %44 = vector.extract_strided_slice %41 {offsets = [0, 64], sizes = [4, 32], strides = [1, 1]} : vector<4x128xf32> to vector<4x32xf32>
    %45 = vector.extract_strided_slice %40 {offsets = [0, 96], sizes = [4, 32], strides = [1, 1]} : vector<4x128xf32> to vector<4x32xf32>
    %46 = arith.mulf %43, %28 : vector<4x32xf32>
    %47 = arith.mulf %42, %44 : vector<4x32xf32>
    %48 = arith.addf %46, %47 : vector<4x32xf32>
    %49 = math.tanh %48 : vector<4x32xf32>
    %50 = arith.mulf %45, %49 : vector<4x32xf32>
    %c2_i32 = arith.constant 2 : i32
    %51 = arith.index_cast %c2_i32 : i32 to index
    %c0_20 = arith.constant 0 : index
    %c0_21 = arith.constant 0 : index
    %52 = vector.load %arg7[%51, %c0_20, %c0_21] : memref<8x4x128xf32, #tpu.memory_space<vmem>>, vector<1x4x128xf32>
    %53 = vector.shape_cast %52 : vector<1x4x128xf32> to vector<4x128xf32>
    %cst_22 = arith.constant dense<0.000000e+00> : vector<4x128xf32>
    %54 = tpu.matmul %50, %8, %cst_22 {dimension_numbers = #tpu.dot_dimension_numbers<[1], [0], [0], [1], [0, 0, 1, 1], [], []>} : vector<4x32xf32>, vector<32x128xf32>, vector<4x128xf32> -> vector<4x128xf32>
    %55 = arith.addf %53, %54 : vector<4x128xf32>
    %56 = arith.negf %55 : vector<4x128xf32>
    %57 = math.exp %56 : vector<4x128xf32>
    %cst_23 = arith.constant 1.000000e+00 : f32
    %58 = vector.broadcast %cst_23 : f32 to vector<4x128xf32>
    %59 = arith.addf %58, %57 : vector<4x128xf32>
    %60 = arith.divf %58, %59 : vector<4x128xf32>
    %61 = math.tanh %55 : vector<4x128xf32>
    %62 = vector.extract_strided_slice %60 {offsets = [0, 0], sizes = [4, 32], strides = [1, 1]} : vector<4x128xf32> to vector<4x32xf32>
    %63 = vector.extract_strided_slice %60 {offsets = [0, 32], sizes = [4, 32], strides = [1, 1]} : vector<4x128xf32> to vector<4x32xf32>
    %64 = vector.extract_strided_slice %61 {offsets = [0, 64], sizes = [4, 32], strides = [1, 1]} : vector<4x128xf32> to vector<4x32xf32>
    %65 = vector.extract_strided_slice %60 {offsets = [0, 96], sizes = [4, 32], strides = [1, 1]} : vector<4x128xf32> to vector<4x32xf32>
    %66 = arith.mulf %63, %48 : vector<4x32xf32>
    %67 = arith.mulf %62, %64 : vector<4x32xf32>
    %68 = arith.addf %66, %67 : vector<4x32xf32>
    %69 = math.tanh %68 : vector<4x32xf32>
    %70 = arith.mulf %65, %69 : vector<4x32xf32>
    %c3_i32 = arith.constant 3 : i32
    %71 = arith.index_cast %c3_i32 : i32 to index
    %c0_24 = arith.constant 0 : index
    %c0_25 = arith.constant 0 : index
    %72 = vector.load %arg7[%71, %c0_24, %c0_25] : memref<8x4x128xf32, #tpu.memory_space<vmem>>, vector<1x4x128xf32>
    %73 = vector.shape_cast %72 : vector<1x4x128xf32> to vector<4x128xf32>
    %cst_26 = arith.constant dense<0.000000e+00> : vector<4x128xf32>
    %74 = tpu.matmul %70, %8, %cst_26 {dimension_numbers = #tpu.dot_dimension_numbers<[1], [0], [0], [1], [0, 0, 1, 1], [], []>} : vector<4x32xf32>, vector<32x128xf32>, vector<4x128xf32> -> vector<4x128xf32>
    %75 = arith.addf %73, %74 : vector<4x128xf32>
    %76 = arith.negf %75 : vector<4x128xf32>
    %77 = math.exp %76 : vector<4x128xf32>
    %cst_27 = arith.constant 1.000000e+00 : f32
    %78 = vector.broadcast %cst_27 : f32 to vector<4x128xf32>
    %79 = arith.addf %78, %77 : vector<4x128xf32>
    %80 = arith.divf %78, %79 : vector<4x128xf32>
    %81 = math.tanh %75 : vector<4x128xf32>
    %82 = vector.extract_strided_slice %80 {offsets = [0, 0], sizes = [4, 32], strides = [1, 1]} : vector<4x128xf32> to vector<4x32xf32>
    %83 = vector.extract_strided_slice %80 {offsets = [0, 32], sizes = [4, 32], strides = [1, 1]} : vector<4x128xf32> to vector<4x32xf32>
    %84 = vector.extract_strided_slice %81 {offsets = [0, 64], sizes = [4, 32], strides = [1, 1]} : vector<4x128xf32> to vector<4x32xf32>
    %85 = vector.extract_strided_slice %80 {offsets = [0, 96], sizes = [4, 32], strides = [1, 1]} : vector<4x128xf32> to vector<4x32xf32>
    %86 = arith.mulf %83, %68 : vector<4x32xf32>
    %87 = arith.mulf %82, %84 : vector<4x32xf32>
    %88 = arith.addf %86, %87 : vector<4x32xf32>
    %89 = math.tanh %88 : vector<4x32xf32>
    %90 = arith.mulf %85, %89 : vector<4x32xf32>
    %c4_i32 = arith.constant 4 : i32
    %91 = arith.index_cast %c4_i32 : i32 to index
    %c0_28 = arith.constant 0 : index
    %c0_29 = arith.constant 0 : index
    %92 = vector.load %arg7[%91, %c0_28, %c0_29] : memref<8x4x128xf32, #tpu.memory_space<vmem>>, vector<1x4x128xf32>
    %93 = vector.shape_cast %92 : vector<1x4x128xf32> to vector<4x128xf32>
    %cst_30 = arith.constant dense<0.000000e+00> : vector<4x128xf32>
    %94 = tpu.matmul %90, %8, %cst_30 {dimension_numbers = #tpu.dot_dimension_numbers<[1], [0], [0], [1], [0, 0, 1, 1], [], []>} : vector<4x32xf32>, vector<32x128xf32>, vector<4x128xf32> -> vector<4x128xf32>
    %95 = arith.addf %93, %94 : vector<4x128xf32>
    %96 = arith.negf %95 : vector<4x128xf32>
    %97 = math.exp %96 : vector<4x128xf32>
    %cst_31 = arith.constant 1.000000e+00 : f32
    %98 = vector.broadcast %cst_31 : f32 to vector<4x128xf32>
    %99 = arith.addf %98, %97 : vector<4x128xf32>
    %100 = arith.divf %98, %99 : vector<4x128xf32>
    %101 = math.tanh %95 : vector<4x128xf32>
    %102 = vector.extract_strided_slice %100 {offsets = [0, 0], sizes = [4, 32], strides = [1, 1]} : vector<4x128xf32> to vector<4x32xf32>
    %103 = vector.extract_strided_slice %100 {offsets = [0, 32], sizes = [4, 32], strides = [1, 1]} : vector<4x128xf32> to vector<4x32xf32>
    %104 = vector.extract_strided_slice %101 {offsets = [0, 64], sizes = [4, 32], strides = [1, 1]} : vector<4x128xf32> to vector<4x32xf32>
    %105 = vector.extract_strided_slice %100 {offsets = [0, 96], sizes = [4, 32], strides = [1, 1]} : vector<4x128xf32> to vector<4x32xf32>
    %106 = arith.mulf %103, %88 : vector<4x32xf32>
    %107 = arith.mulf %102, %104 : vector<4x32xf32>
    %108 = arith.addf %106, %107 : vector<4x32xf32>
    %109 = math.tanh %108 : vector<4x32xf32>
    %110 = arith.mulf %105, %109 : vector<4x32xf32>
    %c5_i32 = arith.constant 5 : i32
    %111 = arith.index_cast %c5_i32 : i32 to index
    %c0_32 = arith.constant 0 : index
    %c0_33 = arith.constant 0 : index
    %112 = vector.load %arg7[%111, %c0_32, %c0_33] : memref<8x4x128xf32, #tpu.memory_space<vmem>>, vector<1x4x128xf32>
    %113 = vector.shape_cast %112 : vector<1x4x128xf32> to vector<4x128xf32>
    %cst_34 = arith.constant dense<0.000000e+00> : vector<4x128xf32>
    %114 = tpu.matmul %110, %8, %cst_34 {dimension_numbers = #tpu.dot_dimension_numbers<[1], [0], [0], [1], [0, 0, 1, 1], [], []>} : vector<4x32xf32>, vector<32x128xf32>, vector<4x128xf32> -> vector<4x128xf32>
    %115 = arith.addf %113, %114 : vector<4x128xf32>
    %116 = arith.negf %115 : vector<4x128xf32>
    %117 = math.exp %116 : vector<4x128xf32>
    %cst_35 = arith.constant 1.000000e+00 : f32
    %118 = vector.broadcast %cst_35 : f32 to vector<4x128xf32>
    %119 = arith.addf %118, %117 : vector<4x128xf32>
    %120 = arith.divf %118, %119 : vector<4x128xf32>
    %121 = math.tanh %115 : vector<4x128xf32>
    %122 = vector.extract_strided_slice %120 {offsets = [0, 0], sizes = [4, 32], strides = [1, 1]} : vector<4x128xf32> to vector<4x32xf32>
    %123 = vector.extract_strided_slice %120 {offsets = [0, 32], sizes = [4, 32], strides = [1, 1]} : vector<4x128xf32> to vector<4x32xf32>
    %124 = vector.extract_strided_slice %121 {offsets = [0, 64], sizes = [4, 32], strides = [1, 1]} : vector<4x128xf32> to vector<4x32xf32>
    %125 = vector.extract_strided_slice %120 {offsets = [0, 96], sizes = [4, 32], strides = [1, 1]} : vector<4x128xf32> to vector<4x32xf32>
    %126 = arith.mulf %123, %108 : vector<4x32xf32>
    %127 = arith.mulf %122, %124 : vector<4x32xf32>
    %128 = arith.addf %126, %127 : vector<4x32xf32>
    %129 = math.tanh %128 : vector<4x32xf32>
    %130 = arith.mulf %125, %129 : vector<4x32xf32>
    %c6_i32 = arith.constant 6 : i32
    %131 = arith.index_cast %c6_i32 : i32 to index
    %c0_36 = arith.constant 0 : index
    %c0_37 = arith.constant 0 : index
    %132 = vector.load %arg7[%131, %c0_36, %c0_37] : memref<8x4x128xf32, #tpu.memory_space<vmem>>, vector<1x4x128xf32>
    %133 = vector.shape_cast %132 : vector<1x4x128xf32> to vector<4x128xf32>
    %cst_38 = arith.constant dense<0.000000e+00> : vector<4x128xf32>
    %134 = tpu.matmul %130, %8, %cst_38 {dimension_numbers = #tpu.dot_dimension_numbers<[1], [0], [0], [1], [0, 0, 1, 1], [], []>} : vector<4x32xf32>, vector<32x128xf32>, vector<4x128xf32> -> vector<4x128xf32>
    %135 = arith.addf %133, %134 : vector<4x128xf32>
    %136 = arith.negf %135 : vector<4x128xf32>
    %137 = math.exp %136 : vector<4x128xf32>
    %cst_39 = arith.constant 1.000000e+00 : f32
    %138 = vector.broadcast %cst_39 : f32 to vector<4x128xf32>
    %139 = arith.addf %138, %137 : vector<4x128xf32>
    %140 = arith.divf %138, %139 : vector<4x128xf32>
    %141 = math.tanh %135 : vector<4x128xf32>
    %142 = vector.extract_strided_slice %140 {offsets = [0, 0], sizes = [4, 32], strides = [1, 1]} : vector<4x128xf32> to vector<4x32xf32>
    %143 = vector.extract_strided_slice %140 {offsets = [0, 32], sizes = [4, 32], strides = [1, 1]} : vector<4x128xf32> to vector<4x32xf32>
    %144 = vector.extract_strided_slice %141 {offsets = [0, 64], sizes = [4, 32], strides = [1, 1]} : vector<4x128xf32> to vector<4x32xf32>
    %145 = vector.extract_strided_slice %140 {offsets = [0, 96], sizes = [4, 32], strides = [1, 1]} : vector<4x128xf32> to vector<4x32xf32>
    %146 = arith.mulf %143, %128 : vector<4x32xf32>
    %147 = arith.mulf %142, %144 : vector<4x32xf32>
    %148 = arith.addf %146, %147 : vector<4x32xf32>
    %149 = math.tanh %148 : vector<4x32xf32>
    %150 = arith.mulf %145, %149 : vector<4x32xf32>
    %c7_i32 = arith.constant 7 : i32
    %151 = arith.index_cast %c7_i32 : i32 to index
    %c0_40 = arith.constant 0 : index
    %c0_41 = arith.constant 0 : index
    %152 = vector.load %arg7[%151, %c0_40, %c0_41] : memref<8x4x128xf32, #tpu.memory_space<vmem>>, vector<1x4x128xf32>
    %153 = vector.shape_cast %152 : vector<1x4x128xf32> to vector<4x128xf32>
    %cst_42 = arith.constant dense<0.000000e+00> : vector<4x128xf32>
    %154 = tpu.matmul %150, %8, %cst_42 {dimension_numbers = #tpu.dot_dimension_numbers<[1], [0], [0], [1], [0, 0, 1, 1], [], []>} : vector<4x32xf32>, vector<32x128xf32>, vector<4x128xf32> -> vector<4x128xf32>
    %155 = arith.addf %153, %154 : vector<4x128xf32>
    %156 = arith.negf %155 : vector<4x128xf32>
    %157 = math.exp %156 : vector<4x128xf32>
    %cst_43 = arith.constant 1.000000e+00 : f32
    %158 = vector.broadcast %cst_43 : f32 to vector<4x128xf32>
    %159 = arith.addf %158, %157 : vector<4x128xf32>
    %160 = arith.divf %158, %159 : vector<4x128xf32>
    %161 = math.tanh %155 : vector<4x128xf32>
    %162 = vector.extract_strided_slice %160 {offsets = [0, 0], sizes = [4, 32], strides = [1, 1]} : vector<4x128xf32> to vector<4x32xf32>
    %163 = vector.extract_strided_slice %160 {offsets = [0, 32], sizes = [4, 32], strides = [1, 1]} : vector<4x128xf32> to vector<4x32xf32>
    %164 = vector.extract_strided_slice %161 {offsets = [0, 64], sizes = [4, 32], strides = [1, 1]} : vector<4x128xf32> to vector<4x32xf32>
    %165 = vector.extract_strided_slice %160 {offsets = [0, 96], sizes = [4, 32], strides = [1, 1]} : vector<4x128xf32> to vector<4x32xf32>
    %166 = arith.mulf %163, %148 : vector<4x32xf32>
    %167 = arith.mulf %162, %164 : vector<4x32xf32>
    %168 = arith.addf %166, %167 : vector<4x32xf32>
    %169 = math.tanh %168 : vector<4x32xf32>
    %170 = arith.mulf %165, %169 : vector<4x32xf32>
    %c8_i32 = arith.constant 8 : i32
    %171 = vector.extract_strided_slice %170 {offsets = [0, 0], sizes = [2, 32], strides = [1, 1]} : vector<4x32xf32> to vector<2x32xf32>
    %172 = vector.extract_strided_slice %170 {offsets = [2, 0], sizes = [2, 32], strides = [1, 1]} : vector<4x32xf32> to vector<2x32xf32>
    %173 = tpu.concatenate %171, %172 in 1 : vector<2x32xf32>, vector<2x32xf32> -> vector<2x64xf32>
    %c0_44 = arith.constant 0 : index
    %c0_45 = arith.constant 0 : index
    %174 = vector.load %arg4[%c0_44, %c0_45] : memref<1x64xf32, #tpu.memory_space<vmem>>, vector<1x64xf32>
    %175 = vector.broadcast %174 : vector<1x64xf32> to vector<2x64xf32>
    %176 = arith.mulf %173, %175 : vector<2x64xf32>
    %cst_46 = arith.constant dense<0.000000e+00> : vector<2xf32>
    %177 = vector.multi_reduction <add>, %176, %cst_46 [1] : vector<2x64xf32> to vector<2xf32>
    %178 = vector.shape_cast %177 : vector<2xf32> to vector<2x1xf32>
    %c0_47 = arith.constant 0 : index
    %c0_48 = arith.constant 0 : index
    %179 = vector.load %arg5[%c0_47, %c0_48] : memref<1x1xf32, #tpu.memory_space<vmem>>, vector<1x1xf32>
    %180 = vector.broadcast %179 : vector<1x1xf32> to vector<2x1xf32>
    %181 = arith.addf %178, %180 : vector<2x1xf32>
    %c0_49 = arith.constant 0 : index
    %c0_50 = arith.constant 0 : index
    %182 = vector.load %arg6[%c0_49, %c0_50] : memref<2x1xf32, #tpu.memory_space<vmem>>, vector<2x1xf32>
    tpu.vector_store %arg6[%c0_49, %c0_50], %181 {strides = array<i32>} : memref<2x1xf32, #tpu.memory_space<vmem>>, vector<2x1xf32>,
    return
  }
}

</mosaic_0001>

<bundles_post_ra>
// kernel: tpu_custom_call.1
= control target key start
LH: loop header
LB: loop body
LE: loop exit
PB: predicated region body
PF: predicated region fallthrough
CT: control target
= control target key end

     0   :  { %vm35_vm0 = vcmask 130048   ;;  %v737_v7 = vmov 0.0   ;;  %s738_s11 = smov 64   ;;  %vm102_vm5 = vcmask 261120   ;;  %s908_s1 = inlined_call_operand.vmem [shape: f32[16,128], index: 1, kind: input, shape index: {}]   ;;  %s909_s0 = inlined_call_operand.vmem [shape: f32[32,16], index: 0, kind: input, shape index: {}]   ;;  %s910_s2 = inlined_call_operand.vmem [shape: f32[32,128], index: 2, kind: input, shape index: {}]   ;;  %s911_s3 = inlined_call_operand.vmem [shape: f32[1,128], index: 3, kind: input, shape index: {}]   ;;  %s912_s4 = inlined_call_operand.vmem [shape: f32[1,64], index: 4, kind: input, shape index: {}]   ;;  %s913_s5 = inlined_call_operand.<no memory space> [shape: f32[1,1], index: 5, kind: input, shape index: {}]   ;;  %s914_s6 = inlined_call_operand.vmem [shape: f32[2,1], index: 6, kind: output, shape index: {}]  }
   0x1   :  { %v30_v0 = vld [vmem:[%s908_s1 + $0x8] sm:$0xff]  ;;  %v29_v1 = vld [vmem:[%s908_s1] sm:$0xff]  ;;  %v787_v3 = vld [vmem:[%s910_s2 + $0x18] sm:$0xff] }
   0x2   :  { %62 = vmatpush.msra.mxu0 %v30_v0  ;;  %v25_v2 = vld [vmem:[%s909_s0] sm:$0xff]  ;;  %v792_v4 = vld [vmem:[%s910_s2 + $0x10] sm:$0xff]  ;;  %118 = vmatpush.msra.mxu1 %v787_v3  ;;  %v799_v5 = vld [vmem:[%s910_s2 + $0x8] sm:$0xff] }
   0x3   :  { %183 = vmatpush.msra.mxu2 %v787_v3  ;;  %248 = vmatpush.msra.mxu3 %v787_v3  ;;  %v807_v6 = vld [vmem:[%s910_s2] sm:$0xff]  ;;  %v26_v61 = vld [vmem:[%s909_s0 + $0x8] sm:$0xff] }
   0x4   :  { %63 = vmatpush.msra.mxu0 %v29_v1  ;;  %119 = vmatpush.msra.mxu1 %v792_v4  ;;  %v836_v8 = vld [vmem:[%s911_s3] ss:$0 sm:$0xff]  ;;  %s739_s3 = smov 32  }
   0x5   :  { %648 = vmatmul.msk.f32.vlgmr.msra.gmra.mxu0 %vm35_vm0, %v25_v2  ;;  %184 = vmatpush.msra.mxu2 %v792_v4 }
   0x6   :  { %249 = vmatpush.msra.mxu3 %v792_v4  ;;  %120 = vmatpush.msra.mxu1 %v799_v5 }
   0x7   :  { %185 = vmatpush.msra.mxu2 %v799_v5 }
   0x8   :  { %250 = vmatpush.msra.mxu3 %v799_v5  ;;  %121 = vmatpush.msra.mxu1 %v807_v6 }
   0x9   :  { %122 = vmatmul.f32.vlgmr.msra.gmra.mxu1 %v737_v7  ;;  %186 = vmatpush.msra.mxu2 %v807_v6 }
   0xa   :  { %251 = vmatpush.msra.mxu3 %v807_v6  ;;  %313 = vmatpush.msrb.mxu1 %v787_v3 }
   0xb   :  { %378 = vmatpush.msrb.mxu2 %v787_v3 }
   0xc   :  { %443 = vmatpush.msrb.mxu3 %v787_v3  ;;  %314 = vmatpush.msrb.mxu1 %v792_v4 }
   0xd   :  { %379 = vmatpush.msrb.mxu2 %v792_v4  ;;  %649 = vmatmul.msk.f32.gmra.mxu0 %vm35_vm0, %v26_v61 }
   0xe   :  { %444 = vmatpush.msrb.mxu3 %v792_v4  ;;  %315 = vmatpush.msrb.mxu1 %v799_v5 }
   0xf   :  { %380 = vmatpush.msrb.mxu2 %v799_v5 }
  0x10   :  { %445 = vmatpush.msrb.mxu3 %v799_v5  ;;  %316 = vmatpush.msrb.mxu1 %v807_v6 }
  0x11   :  { %381 = vmatpush.msrb.mxu2 %v807_v6 }
  0x12   :  { %446 = vmatpush.msrb.mxu3 %v807_v6  ;;  %508 = vmatpush.msra.mxu1 %v787_v3 }
  0x14   :  { %509 = vmatpush.msra.mxu1 %v792_v4 }
  0x16   :  { %510 = vmatpush.msra.mxu1 %v799_v5 }
  0x18   :  { %511 = vmatpush.msra.mxu1 %v807_v6 }
  0x82   :  { %v65_v9 = vpop.f32.mrf.mxu0 }
  0x83   :  { %v66_v10 = vadd.f32 %v836_v8, %v65_v9 }
  0x85   :  { %v81_v11 = vrot.slane %v66_v10, 4  ;;  %89 = vst [vmem:[#allocation2] sm:$0xf] %v66_v10 }
  0x86   :  { %v123_v12 = vpop.f32.mrf.mxu1 }
  0x87   :  { %90 = vst [vmem:[#allocation2 + $0x4] sm:$0xf] %v81_v11 }
  0x8a   :  { %v68_v0 = vpop.f32.mrf.mxu0 }
  0x8b   :  { %v69_v1 = vadd.f32 %v836_v8, %v68_v0 }
  0x8c   :  { %v101_v13 = vld [vmem:[#allocation2] sm:$0xf] }
  0x8d   :  { %v126_v14 = vadd.f32 %v123_v12, %v101_v13  ;;  %v82_v2 = vrot.slane %v69_v1, 4  ;;  %91 = vst [vmem:[#allocation2 + $0x8] sm:$0xf] %v69_v1 }
  0x8e   :  { %v165_v38 = vld [vmem:[#allocation2 + $0x4] sm:$0xf] }
  0x8f   :  { %673 = vtanh.f32 %v126_v14  ;;  %v652_v16 = vmul.f32 -1.442695, %v126_v14  ;;  %92 = vst [vmem:[#allocation2 + $0xc] sm:$0xf] %v82_v2 }
  0x91   :  { %675 = vpow2.f32 %v652_v16 }
  0x95   :  { %v674_v15 = vpop.eup %673 }
  0x96   :  { %149 = vrot.lane.b32.xlu0 %v674_v15, %s738_s11 }
  0x97   :  { %v676_v17 = vpop.eup %675 }
  0x98   :  { %v130_v18 = vadd.f32 1.0, %v676_v17 }
  0x9a   :  { %677 = vrcp.f32 %v130_v18  ;;  %v142_v24 = vand.u32 2147483648, %v130_v18  ;;  %vm136_vm2 = vweird.f32 %v130_v18  ;;  %v140_v25 = vand.u32 2147483647, %v130_v18 }
  0x9c   :  { %v143_v27 = vor.u32 1.1754944e-38, %v142_v24  ;;  %vm141_vm4 = vcmp.eq.f32.partialorder %v140_v25, 8.507059e+37 }
  0xa0   :  { %v678_v19 = vpop.eup %677 }
  0xa1   :  { %v132_v20 = vmul.f32 %v678_v19, %v130_v18  ;;  %vm137_vm1 = vweird.f32 %v678_v19 }
  0xa2   :  { %vm138_vm3 = vmor %vm136_vm2, %vm137_vm1 }
  0xa3   :  { %v133_v21 = vsub.f32 1.0, %v132_v20 }
  0xa5   :  { %v134_v22 = vmul.f32 %v678_v19, %v133_v21 }
  0xa7   :  { %v135_v23 = vadd.f32 %v678_v19, %v134_v22 }
  0xa9   :  { %v139_v26 = vsel %vm138_vm3, %v678_v19, %v135_v23 }
  0xaa   :  { %v144_v29 = vsel %vm141_vm4, %v143_v27, %v139_v26 }
  0xab   :  { %v147_v31 = vmul.f32 0.0, %v144_v29 }
 0x108   :  { %v150_v28 = vpop.permute.xlu0 %149 }
 0x109   :  { %v152_v30 = vmul.f32 %v150_v28, %v144_v29 }
 0x10b   :  { %154 = vrot.lane.b32.xlu0 %v152_v30, %s739_s3 }
 0x17d   :  { %v155_v32 = vpop.permute.xlu0 %154 }
 0x17e   :  { %v157_v33 = vadd.f32 %v155_v32, %v147_v31  ;;  %v295_v31 = vld [vmem:[#allocation2 + $0xc] sm:$0xf] }
 0x180   :  { %679 = vtanh.f32 %v157_v33 }
 0x186   :  { %v680_v34 = vpop.eup %679 }
 0x187   :  { %160 = vrot.lane.b32.xlu1 %v680_v34, %s738_s11 }
 0x1f9   :  { %v161_v35 = vpop.permute.xlu1 %160 }
 0x1fa   :  { %v163_v36 = vmul.f32 %v161_v35, %v144_v29 }
 0x1fc   :  { %167 = vrot.lane.b32.xlu1 %v163_v36, %s739_s3 }
 0x26e   :  { %v168_v37 = vpop.permute.xlu1 %167 }
 0x26f   :  { %653 = vmatmul.msk.f32.vlgmr.msra.gmra.mxu2 %vm102_vm5, %v168_v37 }
 0x270   :  { %573 = vmatpush.msra.mxu2 %v787_v3 }
 0x272   :  { %574 = vmatpush.msra.mxu2 %v792_v4  ;;  %v230_v4 = vld [vmem:[#allocation2 + $0x8] sm:$0xf] }
 0x274   :  { %575 = vmatpush.msra.mxu2 %v799_v5 }
 0x276   :  { %576 = vmatpush.msra.mxu2 %v807_v6 }
 0x2f2   :  { %v188_v39 = vpop.f32.mrf.mxu2 }
 0x2f3   :  { %v191_v40 = vadd.f32 %v188_v39, %v165_v38 }
 0x2f5   :  { %681 = vtanh.f32 %v191_v40  ;;  %v654_v42 = vmul.f32 -1.442695, %v191_v40 }
 0x2f7   :  { %683 = vpow2.f32 %v654_v42 }
 0x2fb   :  { %v682_v41 = vpop.eup %681 }
 0x2fc   :  { %214 = vrot.lane.b32.xlu2 %v682_v41, %s738_s11 }
 0x2fd   :  { %v684_v43 = vpop.eup %683 }
 0x2fe   :  { %v195_v44 = vadd.f32 1.0, %v684_v43 }
 0x300   :  { %685 = vrcp.f32 %v195_v44  ;;  %v207_v50 = vand.u32 2147483648, %v195_v44  ;;  %vm201_vm7 = vweird.f32 %v195_v44  ;;  %v205_v51 = vand.u32 2147483647, %v195_v44 }
 0x302   :  { %v208_v53 = vor.u32 1.1754944e-38, %v207_v50  ;;  %vm206_vm9 = vcmp.eq.f32.partialorder %v205_v51, 8.507059e+37 }
 0x306   :  { %v686_v45 = vpop.eup %685 }
 0x307   :  { %v197_v46 = vmul.f32 %v686_v45, %v195_v44  ;;  %vm202_vm6 = vweird.f32 %v686_v45 }
 0x308   :  { %vm203_vm8 = vmor %vm201_vm7, %vm202_vm6 }
 0x309   :  { %v198_v47 = vsub.f32 1.0, %v197_v46 }
 0x30b   :  { %v199_v48 = vmul.f32 %v686_v45, %v198_v47 }
 0x30d   :  { %v200_v49 = vadd.f32 %v686_v45, %v199_v48 }
 0x30f   :  { %v204_v52 = vsel %vm203_vm8, %v686_v45, %v200_v49 }
 0x310   :  { %v209_v55 = vsel %vm206_vm9, %v208_v53, %v204_v52 }
 0x311   :  { %v212_v57 = vmul.f32 %v209_v55, %v157_v33 }
 0x356   :  { %v215_v54 = vpop.permute.xlu2 %214 }
 0x357   :  { %v217_v56 = vmul.f32 %v215_v54, %v209_v55  ;;  %v27_v54 = vld [vmem:[%s909_s0 + $0x10] sm:$0xff] }
 0x358   :  { %650 = vmatmul.msk.f32.gmra.mxu0 %vm35_vm0, %v27_v54 }
 0x359   :  { %219 = vrot.lane.b32.xlu2 %v217_v56, %s739_s3 }
 0x3b3   :  { %v220_v58 = vpop.permute.xlu2 %219 }
 0x3b4   :  { %v222_v59 = vadd.f32 %v220_v58, %v212_v57 }
 0x3b6   :  { %687 = vtanh.f32 %v222_v59 }
 0x3bc   :  { %v688_v60 = vpop.eup %687 }
 0x3bd   :  { %225 = vrot.lane.b32.xlu0 %v688_v60, %s738_s11 }
 0x3d5   :  { %v71_v57 = vpop.f32.mrf.mxu0 }
 0x3d6   :  { %v72_v58 = vadd.f32 %v836_v8, %v71_v57 }
 0x3d8   :  { %93 = vst [vmem:[#allocation2 + $0x10] sm:$0xf] %v72_v58 }
 0x3df   :  { %v360_v61 = vld [vmem:[#allocation2 + $0x10] sm:$0xf] }
 0x42f   :  { %v226_v62 = vpop.permute.xlu0 %225 }
 0x430   :  { %v228_v63 = vmul.f32 %v226_v62, %v209_v55 }
 0x432   :  { %232 = vrot.lane.b32.xlu1 %v228_v63, %s739_s3 }
 0x4a4   :  { %v233_v3 = vpop.permute.xlu1 %232 }
 0x4a5   :  { %655 = vmatmul.msk.f32.vlgmr.msra.gmra.mxu3 %vm102_vm5, %v233_v3 }
 0x528   :  { %v253_v5 = vpop.f32.mrf.mxu3 }
 0x529   :  { %v256_v6 = vadd.f32 %v253_v5, %v230_v4 }
 0x52b   :  { %689 = vtanh.f32 %v256_v6  ;;  %v656_v9 = vmul.f32 -1.442695, %v256_v6 }
 0x52d   :  { %691 = vpow2.f32 %v656_v9 }
 0x531   :  { %v690_v7 = vpop.eup %689 }
 0x532   :  { %279 = vrot.lane.b32.xlu2 %v690_v7, %s738_s11 }
 0x533   :  { %v692_v10 = vpop.eup %691 }
 0x534   :  { %v260_v11 = vadd.f32 1.0, %v692_v10 }
 0x536   :  { %693 = vrcp.f32 %v260_v11  ;;  %v272_v17 = vand.u32 2147483648, %v260_v11  ;;  %vm266_vm11 = vweird.f32 %v260_v11  ;;  %v270_v18 = vand.u32 2147483647, %v260_v11 }
 0x538   :  { %v273_v20 = vor.u32 1.1754944e-38, %v272_v17  ;;  %vm271_vm13 = vcmp.eq.f32.partialorder %v270_v18, 8.507059e+37 }
 0x53c   :  { %v694_v12 = vpop.eup %693 }
 0x53d   :  { %v262_v13 = vmul.f32 %v694_v12, %v260_v11  ;;  %vm267_vm10 = vweird.f32 %v694_v12 }
 0x53e   :  { %vm268_vm12 = vmor %vm266_vm11, %vm267_vm10 }
 0x53f   :  { %v263_v14 = vsub.f32 1.0, %v262_v13 }
 0x541   :  { %v264_v15 = vmul.f32 %v694_v12, %v263_v14 }
 0x543   :  { %v265_v16 = vadd.f32 %v694_v12, %v264_v15 }
 0x545   :  { %v269_v19 = vsel %vm268_vm12, %v694_v12, %v265_v16 }
 0x546   :  { %v274_v22 = vsel %vm271_vm13, %v273_v20, %v269_v19 }
 0x547   :  { %v277_v24 = vmul.f32 %v274_v22, %v222_v59  ;;  %v83_v59 = vrot.slane %v72_v58, 4 }
 0x549   :  { %94 = vst [vmem:[#allocation2 + $0x14] sm:$0xf] %v83_v59 }
 0x58c   :  { %v280_v21 = vpop.permute.xlu2 %279 }
 0x58d   :  { %v282_v23 = vmul.f32 %v280_v21, %v274_v22 }
 0x58f   :  { %284 = vrot.lane.b32.xlu0 %v282_v23, %s739_s3 }
 0x601   :  { %v285_v25 = vpop.permute.xlu0 %284 }
 0x602   :  { %v287_v26 = vadd.f32 %v285_v25, %v277_v24  ;;  %v425_v24 = vld [vmem:[#allocation2 + $0x14] sm:$0xf] }
 0x604   :  { %695 = vtanh.f32 %v287_v26 }
 0x60a   :  { %v696_v27 = vpop.eup %695 }
 0x60b   :  { %290 = vrot.lane.b32.xlu1 %v696_v27, %s738_s11 }
 0x67d   :  { %v291_v28 = vpop.permute.xlu1 %290 }
 0x67e   :  { %v293_v29 = vmul.f32 %v291_v28, %v274_v22 }
 0x680   :  { %297 = vrot.lane.b32.xlu2 %v293_v29, %s739_s3 }
 0x6da   :  { %v298_v30 = vpop.permute.xlu2 %297 }
 0x6db   :  { %657 = vmatmul.msk.f32.vlgmr.msrb.gmra.mxu1 %vm102_vm5, %v298_v30 }
 0x758   :  { %v318_v32 = vpop.f32.mrf.mxu1 }
 0x759   :  { %v321_v33 = vadd.f32 %v318_v32, %v295_v31 }
 0x75b   :  { %697 = vtanh.f32 %v321_v33  ;;  %v658_v35 = vmul.f32 -1.442695, %v321_v33 }
 0x75d   :  { %699 = vpow2.f32 %v658_v35 }
 0x761   :  { %v698_v34 = vpop.eup %697 }
 0x762   :  { %344 = vrot.lane.b32.xlu0 %v698_v34, %s738_s11 }
 0x763   :  { %v700_v36 = vpop.eup %699 }
 0x764   :  { %v325_v37 = vadd.f32 1.0, %v700_v36 }
 0x766   :  { %701 = vrcp.f32 %v325_v37  ;;  %v337_v43 = vand.u32 2147483648, %v325_v37  ;;  %vm331_vm15 = vweird.f32 %v325_v37  ;;  %v335_v44 = vand.u32 2147483647, %v325_v37 }
 0x768   :  { %v338_v46 = vor.u32 1.1754944e-38, %v337_v43  ;;  %vm336_vm2 = vcmp.eq.f32.partialorder %v335_v44, 8.507059e+37 }
 0x76c   :  { %v702_v38 = vpop.eup %701 }
 0x76d   :  { %v327_v39 = vmul.f32 %v702_v38, %v325_v37  ;;  %vm332_vm14 = vweird.f32 %v702_v38 }
 0x76e   :  { %vm333_vm1 = vmor %vm331_vm15, %vm332_vm14 }
 0x76f   :  { %v328_v40 = vsub.f32 1.0, %v327_v39 }
 0x771   :  { %v329_v41 = vmul.f32 %v702_v38, %v328_v40 }
 0x773   :  { %v330_v42 = vadd.f32 %v702_v38, %v329_v41 }
 0x775   :  { %v334_v45 = vsel %vm333_vm1, %v702_v38, %v330_v42 }
 0x776   :  { %v339_v48 = vsel %vm336_vm2, %v338_v46, %v334_v45 }
 0x777   :  { %v342_v50 = vmul.f32 %v339_v48, %v287_v26 }
 0x7d4   :  { %v345_v47 = vpop.permute.xlu0 %344 }
 0x7d5   :  { %v347_v49 = vmul.f32 %v345_v47, %v339_v48  ;;  %v28_v47 = vld [vmem:[%s909_s0 + $0x18] sm:$0xff] }
 0x7d6   :  { %651 = vmatmul.msk.f32.gmra.mxu0 %vm35_vm0, %v28_v47 }
 0x7d7   :  { %349 = vrot.lane.b32.xlu1 %v347_v49, %s739_s3 }
 0x849   :  { %v350_v51 = vpop.permute.xlu1 %349 }
 0x84a   :  { %v352_v52 = vadd.f32 %v350_v51, %v342_v50 }
 0x84c   :  { %703 = vtanh.f32 %v352_v52 }
 0x852   :  { %v704_v53 = vpop.eup %703 }
 0x853   :  { %355 = vrot.lane.b32.xlu2 %v704_v53, %s738_s11  ;;  %v74_v51 = vpop.f32.mrf.mxu0 }
 0x8ad   :  { %v356_v55 = vpop.permute.xlu2 %355 }
 0x8ae   :  { %v358_v56 = vmul.f32 %v356_v55, %v339_v48 }
 0x8b0   :  { %362 = vrot.lane.b32.xlu0 %v358_v56, %s739_s3 }
 0x922   :  { %v363_v60 = vpop.permute.xlu0 %362 }
 0x923   :  { %659 = vmatmul.msk.f32.vlgmr.msrb.gmra.mxu2 %vm102_vm5, %v363_v60 }
 0x9a6   :  { %v383_v62 = vpop.f32.mrf.mxu2 }
 0x9a7   :  { %v386_v63 = vadd.f32 %v383_v62, %v360_v61 }
 0x9a9   :  { %705 = vtanh.f32 %v386_v63  ;;  %v660_v1 = vmul.f32 -1.442695, %v386_v63 }
 0x9ab   :  { %707 = vpow2.f32 %v660_v1 }
 0x9af   :  { %v706_v0 = vpop.eup %705 }
 0x9b0   :  { %409 = vrot.lane.b32.xlu1 %v706_v0, %s738_s11 }
 0x9b1   :  { %v708_v2 = vpop.eup %707 }
 0x9b2   :  { %v390_v3 = vadd.f32 1.0, %v708_v2 }
 0x9b4   :  { %709 = vrcp.f32 %v390_v3  ;;  %v402_v10 = vand.u32 2147483648, %v390_v3  ;;  %vm396_vm4 = vweird.f32 %v390_v3  ;;  %v400_v11 = vand.u32 2147483647, %v390_v3 }
 0x9b6   :  { %v403_v13 = vor.u32 1.1754944e-38, %v402_v10  ;;  %vm401_vm7 = vcmp.eq.f32.partialorder %v400_v11, 8.507059e+37 }
 0x9ba   :  { %v710_v4 = vpop.eup %709 }
 0x9bb   :  { %v392_v5 = vmul.f32 %v710_v4, %v390_v3  ;;  %vm397_vm3 = vweird.f32 %v710_v4 }
 0x9bc   :  { %vm398_vm6 = vmor %vm396_vm4, %vm397_vm3  ;;  %vm633_vm4 = vcmask 517120  }
 0x9bd   :  { %v393_v6 = vsub.f32 1.0, %v392_v5 }
 0x9bf   :  { %v394_v7 = vmul.f32 %v710_v4, %v393_v6 }
 0x9c1   :  { %v395_v9 = vadd.f32 %v710_v4, %v394_v7 }
 0x9c3   :  { %v399_v12 = vsel %vm398_vm6, %v710_v4, %v395_v9  ;;  %vm642_vm6 = vcmask 1024  }
 0x9c4   :  { %v404_v15 = vsel %vm401_vm7, %v403_v13, %v399_v12 }
 0x9c5   :  { %v407_v17 = vmul.f32 %v404_v15, %v352_v52  ;;  %v75_v52 = vadd.f32 %v836_v8, %v74_v51 }
 0x9c7   :  { %v84_v53 = vrot.slane %v75_v52, 4  ;;  %95 = vst [vmem:[#allocation2 + $0x18] sm:$0xf] %v75_v52 }
 0x9c9   :  { %96 = vst [vmem:[#allocation2 + $0x1c] sm:$0xf] %v84_v53 }
 0x9ce   :  { %v490_v54 = vld [vmem:[#allocation2 + $0x18] sm:$0xf] }
 0xa22   :  { %v410_v14 = vpop.permute.xlu1 %409 }
 0xa23   :  { %v412_v16 = vmul.f32 %v410_v14, %v404_v15 }
 0xa25   :  { %414 = vrot.lane.b32.xlu2 %v412_v16, %s739_s3  ;;  %v555_v16 = vld [vmem:[#allocation2 + $0x1c] sm:$0xf] }
 0xa7f   :  { %v415_v18 = vpop.permute.xlu2 %414 }
 0xa80   :  { %v417_v19 = vadd.f32 %v415_v18, %v407_v17 }
 0xa82   :  { %711 = vtanh.f32 %v417_v19 }
 0xa88   :  { %v712_v20 = vpop.eup %711 }
 0xa89   :  { %420 = vrot.lane.b32.xlu0 %v712_v20, %s738_s11 }
 0xafb   :  { %v421_v21 = vpop.permute.xlu0 %420 }
 0xafc   :  { %v423_v22 = vmul.f32 %v421_v21, %v404_v15 }
 0xafe   :  { %427 = vrot.lane.b32.xlu1 %v423_v22, %s739_s3 }
 0xb70   :  { %v428_v23 = vpop.permute.xlu1 %427 }
 0xb71   :  { %661 = vmatmul.msk.f32.vlgmr.msrb.gmra.mxu3 %vm102_vm5, %v428_v23 }
 0xbf4   :  { %v448_v25 = vpop.f32.mrf.mxu3 }
 0xbf5   :  { %v451_v26 = vadd.f32 %v448_v25, %v425_v24 }
 0xbf7   :  { %713 = vtanh.f32 %v451_v26  ;;  %v662_v28 = vmul.f32 -1.442695, %v451_v26 }
 0xbf9   :  { %715 = vpow2.f32 %v662_v28 }
 0xbfd   :  { %v714_v27 = vpop.eup %713 }
 0xbfe   :  { %474 = vrot.lane.b32.xlu2 %v714_v27, %s738_s11 }
 0xbff   :  { %v716_v29 = vpop.eup %715 }
 0xc00   :  { %v455_v30 = vadd.f32 1.0, %v716_v29 }
 0xc02   :  { %717 = vrcp.f32 %v455_v30  ;;  %v467_v36 = vand.u32 2147483648, %v455_v30  ;;  %vm461_vm9 = vweird.f32 %v455_v30  ;;  %v465_v37 = vand.u32 2147483647, %v455_v30 }
 0xc04   :  { %v468_v39 = vor.u32 1.1754944e-38, %v467_v36  ;;  %vm466_vm11 = vcmp.eq.f32.partialorder %v465_v37, 8.507059e+37 }
 0xc08   :  { %v718_v31 = vpop.eup %717 }
 0xc09   :  { %v457_v32 = vmul.f32 %v718_v31, %v455_v30  ;;  %vm462_vm8 = vweird.f32 %v718_v31 }
 0xc0a   :  { %vm463_vm10 = vmor %vm461_vm9, %vm462_vm8 }
 0xc0b   :  { %v458_v33 = vsub.f32 1.0, %v457_v32 }
 0xc0d   :  { %v459_v34 = vmul.f32 %v718_v31, %v458_v33 }
 0xc0f   :  { %v460_v35 = vadd.f32 %v718_v31, %v459_v34 }
 0xc11   :  { %v464_v38 = vsel %vm463_vm10, %v718_v31, %v460_v35 }
 0xc12   :  { %v469_v41 = vsel %vm466_vm11, %v468_v39, %v464_v38 }
 0xc13   :  { %v472_v43 = vmul.f32 %v469_v41, %v417_v19 }
 0xc58   :  { %v475_v40 = vpop.permute.xlu2 %474 }
 0xc59   :  { %v477_v42 = vmul.f32 %v475_v40, %v469_v41 }
 0xc5b   :  { %479 = vrot.lane.b32.xlu0 %v477_v42, %s739_s3  ;;  %v11_v42 = vstv %s913_s5 }
 0xc5c   :  { %12 = vst [vmem:[#allocation3] sm:$0x1] %v11_v42 }
 0xccd   :  { %v480_v44 = vpop.permute.xlu0 %479 }
 0xcce   :  { %v482_v45 = vadd.f32 %v480_v44, %v472_v43  ;;  %v671_v43 = vld [vmem:[%s912_s4] ss:$0 sm:$0xff] }
 0xcd0   :  { %719 = vtanh.f32 %v482_v45 }
 0xcd6   :  { %v720_v46 = vpop.eup %719 }
 0xcd7   :  { %485 = vrot.lane.b32.xlu1 %v720_v46, %s738_s11 }
 0xd49   :  { %v486_v48 = vpop.permute.xlu1 %485 }
 0xd4a   :  { %v488_v49 = vmul.f32 %v486_v48, %v469_v41 }
 0xd4c   :  { %492 = vrot.lane.b32.xlu2 %v488_v49, %s739_s3  ;;  %v672_v49 = vld [vmem:[#allocation3] ss:$0 sm:$0xff] }
 0xda6   :  { %v493_v50 = vpop.permute.xlu2 %492 }
 0xda7   :  { %663 = vmatmul.msk.f32.vlgmr.msra.gmra.mxu1 %vm102_vm5, %v493_v50 }
 0xe24   :  { %v513_v55 = vpop.f32.mrf.mxu1 }
 0xe25   :  { %v516_v56 = vadd.f32 %v513_v55, %v490_v54 }
 0xe27   :  { %721 = vtanh.f32 %v516_v56  ;;  %v664_v58 = vmul.f32 -1.442695, %v516_v56 }
 0xe29   :  { %723 = vpow2.f32 %v664_v58 }
 0xe2d   :  { %v722_v57 = vpop.eup %721 }
 0xe2e   :  { %539 = vrot.lane.b32.xlu0 %v722_v57, %s738_s11 }
 0xe2f   :  { %v724_v59 = vpop.eup %723 }
 0xe30   :  { %v520_v60 = vadd.f32 1.0, %v724_v59 }
 0xe32   :  { %725 = vrcp.f32 %v520_v60  ;;  %v532_v1 = vand.u32 2147483648, %v520_v60  ;;  %vm526_vm12 = vweird.f32 %v520_v60  ;;  %v530_v2 = vand.u32 2147483647, %v520_v60 }
 0xe34   :  { %v533_v4 = vor.u32 1.1754944e-38, %v532_v1  ;;  %vm531_vm14 = vcmp.eq.f32.partialorder %v530_v2, 8.507059e+37 }
 0xe38   :  { %v726_v61 = vpop.eup %725 }
 0xe39   :  { %v522_v62 = vmul.f32 %v726_v61, %v520_v60  ;;  %vm527_vm0 = vweird.f32 %v726_v61 }
 0xe3a   :  { %vm528_vm13 = vmor %vm526_vm12, %vm527_vm0 }
 0xe3b   :  { %v523_v63 = vsub.f32 1.0, %v522_v62 }
 0xe3d   :  { %v524_v0 = vmul.f32 %v726_v61, %v523_v63 }
 0xe3f   :  { %v525_v8 = vadd.f32 %v726_v61, %v524_v0 }
 0xe41   :  { %v529_v3 = vsel %vm528_vm13, %v726_v61, %v525_v8 }
 0xe42   :  { %v534_v6 = vsel %vm531_vm14, %v533_v4, %v529_v3 }
 0xe43   :  { %v537_v9 = vmul.f32 %v534_v6, %v482_v45 }
 0xea0   :  { %v540_v5 = vpop.permute.xlu0 %539 }
 0xea1   :  { %v542_v7 = vmul.f32 %v540_v5, %v534_v6 }
 0xea3   :  { %544 = vrot.lane.b32.xlu1 %v542_v7, %s739_s3 }
 0xf15   :  { %v545_v10 = vpop.permute.xlu1 %544 }
 0xf16   :  { %v547_v11 = vadd.f32 %v545_v10, %v537_v9 }
 0xf18   :  { %727 = vtanh.f32 %v547_v11 }
 0xf1e   :  { %v728_v12 = vpop.eup %727 }
 0xf1f   :  { %550 = vrot.lane.b32.xlu2 %v728_v12, %s738_s11 }
 0xf79   :  { %v551_v13 = vpop.permute.xlu2 %550 }
 0xf7a   :  { %v553_v14 = vmul.f32 %v551_v13, %v534_v6 }
 0xf7c   :  { %557 = vrot.lane.b32.xlu0 %v553_v14, %s739_s3 }
 0xfee   :  { %v558_v15 = vpop.permute.xlu0 %557 }
 0xfef   :  { %665 = vmatmul.msk.f32.vlgmr.msra.gmra.mxu2 %vm102_vm5, %v558_v15 }
0x1072   :  { %v578_v17 = vpop.f32.mrf.mxu2 }
0x1073   :  { %v581_v18 = vadd.f32 %v578_v17, %v555_v16 }
0x1075   :  { %729 = vtanh.f32 %v581_v18  ;;  %v666_v20 = vmul.f32 -1.442695, %v581_v18 }
0x1077   :  { %731 = vpow2.f32 %v666_v20 }
0x107b   :  { %v730_v19 = vpop.eup %729 }
0x107c   :  { %604 = vrot.lane.b32.xlu1 %v730_v19, %s738_s11 }
0x107d   :  { %v732_v21 = vpop.eup %731 }
0x107e   :  { %v585_v22 = vadd.f32 1.0, %v732_v21 }
0x1080   :  { %733 = vrcp.f32 %v585_v22  ;;  %v597_v28 = vand.u32 2147483648, %v585_v22  ;;  %vm591_vm1 = vweird.f32 %v585_v22  ;;  %v595_v29 = vand.u32 2147483647, %v585_v22 }
0x1082   :  { %v598_v31 = vor.u32 1.1754944e-38, %v597_v28  ;;  %vm596_vm3 = vcmp.eq.f32.partialorder %v595_v29, 8.507059e+37 }
0x1086   :  { %v734_v23 = vpop.eup %733 }
0x1087   :  { %v587_v24 = vmul.f32 %v734_v23, %v585_v22  ;;  %vm592_vm15 = vweird.f32 %v734_v23 }
0x1088   :  { %vm593_vm2 = vmor %vm591_vm1, %vm592_vm15 }
0x1089   :  { %v588_v25 = vsub.f32 1.0, %v587_v24 }
0x108b   :  { %v589_v26 = vmul.f32 %v734_v23, %v588_v25 }
0x108d   :  { %v590_v27 = vadd.f32 %v734_v23, %v589_v26 }
0x108f   :  { %v594_v30 = vsel %vm593_vm2, %v734_v23, %v590_v27 }
0x1090   :  { %v599_v33 = vsel %vm596_vm3, %v598_v31, %v594_v30 }
0x1091   :  { %v602_v35 = vmul.f32 %v599_v33, %v547_v11 }
0x10ee   :  { %v605_v32 = vpop.permute.xlu1 %604 }
0x10ef   :  { %v607_v34 = vmul.f32 %v605_v32, %v599_v33 }
0x10f1   :  { %609 = vrot.lane.b32.xlu2 %v607_v34, %s739_s3 }
0x114b   :  { %v610_v36 = vpop.permute.xlu2 %609 }
0x114c   :  { %v612_v37 = vadd.f32 %v610_v36, %v602_v35 }
0x114e   :  { %735 = vtanh.f32 %v612_v37 }
0x1154   :  { %v736_v38 = vpop.eup %735 }
0x1155   :  { %615 = vrot.lane.b32.xlu0 %v736_v38, %s738_s11 }
0x11c7   :  { %v616_v39 = vpop.permute.xlu0 %615 }
0x11c8   :  { %v618_v40 = vmul.f32 %v616_v39, %v599_v33 }
0x11ca   :  { %v623_v41 = vrot.slane %v618_v40, 2  ;;  %620 = vrot.lane.b32.xlu1 %v618_v40, %s739_s3 }
0x11cc   :  { %624 = vrot.lane.b32.xlu2 %v623_v41, %s738_s11 }
0x1226   :  { %v625_v44 = vpop.permute.xlu2 %624 }
0x123c   :  { %v621_v45 = vpop.permute.xlu1 %620 }
0x123d   :  { %v627_v46 = vsel %vm102_vm5, %v621_v45, %v625_v44 }
0x123e   :  { %v632_v47 = vmul.f32 %v671_v43, %v627_v46 }
0x1240   :  { %v634_v48 = vsel %vm633_vm4, %v632_v47, 0.0 }
0x1241   :  { %635 = vadd.xlane.f32.xlu0 %v634_v48 }
0x12b4   :  { %v636_v50 = vpop.xlane.xlu0 %635 }
0x12b5   :  { %v641_v51 = vadd.f32 %v672_v49, %v636_v50 }
0x12b7   :  { %643 = vst.msk [vmem:[%s914_s6] sm:$0x3] %vm642_vm6, %v641_v51 }

</bundles_post_ra>
